<compile_context>
chip_gen: v6e
topology: v6e:2x2x1
jax: 0.10.0
libtpu: 0.0.40
codegen_flags: <defaults>
</compile_context>

<pallas_src>
import math

import jax
import jax.numpy as jnp
from jax.experimental import pallas as pl
from jax.experimental.pallas import tpu as pltpu

# ----------------------------- configuration -----------------------------
BATCH = 2
SEQ = 8
HIDDEN = 32
NUM_HEADS = 4
KV_HEADS = 2
HEAD_DIM = HIDDEN // NUM_HEADS           # 8
KV_GROUPS = NUM_HEADS // KV_HEADS        # 2
KV_DIM = KV_HEADS * HEAD_DIM             # 16
D = NUM_HEADS * HEAD_DIM                 # 32 (== HIDDEN)


# ------------------------------- kernel ----------------------------------
def attn_rope_kernel(x_ref, wqkv_ref, wo_ref, cos_ref, sin_ref, bias_ref, o_ref):
    # x_ref:    [B*S, H]     f32 hidden states (passed once, no replication)
    # wqkv_ref: [H, 5*D]     bf16 fused  Q | Q@R | K | K@R | V  projection
    # wo_ref:   [D, H]       bf16 output projection
    # cos_ref:  [B*S, D]     f32 RoPE cos, tiled over (batch rows, heads)
    # sin_ref:  [B*S, D]     f32 RoPE sin, tiled over (batch rows, heads)
    # bias_ref: [B*S, B*S]   f32 additive mask: causal within batch, -1e30 across
    # o_ref:    [B*S, H]
    x = x_ref[...]

    # Single fused projection for Q, rotate_half(Q), K, rotate_half(K), V:
    # one [16,32] @ [32,160] MXU push (bf16 operands, f32 accumulation).
    qkv = jnp.dot(x.astype(jnp.bfloat16), wqkv_ref[...],
                  preferred_element_type=jnp.float32)              # [B*S, 5*D]
    q  = qkv[:, 0 * D:1 * D]
    qr = qkv[:, 1 * D:2 * D]   # == rotate_half(q) exactly (R folded into weights)
    k  = qkv[:, 2 * D:3 * D]
    kr = qkv[:, 3 * D:4 * D]   # == rotate_half(k)
    v  = qkv[:, 4 * D:5 * D]

    # RoPE in f32: two multiplies + one add, no lane shuffles, no negate.
    cos = cos_ref[...]
    sin = sin_ref[...]
    q = q * cos + qr * sin
    k = k * cos + kr * sin

    bias = bias_ref[...]
    q_b = q.astype(jnp.bfloat16)
    k_b = k.astype(jnp.bfloat16)
    v_b = v.astype(jnp.bfloat16)

    # Per-head attention core.  The score / PV matmuls are intrinsically
    # per-head (a batched einsum lowers to the same per-head MXU pushes), so a
    # static 4-iteration loop over lane slices is equivalent and avoids
    # sub-vreg reshapes.  Batch separation is handled by the additive bias.
    ctx_heads = []
    for n in range(NUM_HEADS):
        sl = slice(n * HEAD_DIM, (n + 1) * HEAD_DIM)
        s = jnp.einsum("qd,kd->qk", q_b[:, sl], k_b[:, sl],
                       preferred_element_type=jnp.float32) + bias  # [B*S, B*S]
        m = jnp.max(s, axis=-1, keepdims=True)
        p = jnp.exp(s - m)                                         # f32, EUP
        inv_l = 1.0 / jnp.sum(p, axis=-1, keepdims=True)           # exact recip
        ctx = jnp.dot(p.astype(jnp.bfloat16), v_b[:, sl],
                      preferred_element_type=jnp.float32)          # [B*S, hd]
        ctx_heads.append(ctx * inv_l)
    ctx_all = jnp.concatenate(ctx_heads, axis=-1)                  # [B*S, D]

    # Output projection: single matmul, head axis folded into the contraction.
    out = jnp.dot(ctx_all.astype(jnp.bfloat16), wo_ref[...],
                  preferred_element_type=jnp.float32)              # [B*S, H]
    o_ref[...] = out.astype(o_ref.dtype)


# -------------------------- one-time param prep ----------------------------
def prepare_params(wq, wk, wv, wo, cos, sin, batch):
    """Init-time layout plumbing (NOT in the per-call jitted path): GQA
    expansion, rotate_half folding, 1/sqrt(hd) folding, fused weight packing,
    RoPE table tiling, causal additive bias."""
    H, hd, NH, KVH, G, S = HIDDEN, HEAD_DIM, NUM_HEADS, KV_HEADS, KV_GROUPS, SEQ
    half = hd // 2

    def expand_kv(w):                                    # [H, KVH*hd] -> [H, NH*hd]
        w = w.reshape(H, KVH, hd)
        return jnp.repeat(w, G, axis=1).reshape(H, NH * hd)   # repeat_interleave

    wq_s = wq * (1.0 / math.sqrt(hd))                    # fold score scale into Q
    wk_e = expand_kv(wk)
    wv_e = expand_kv(wv)

    # rotate_half as a signed permutation matrix, block-diagonal over heads.
    r_blk = jnp.zeros((hd, hd), jnp.float32)
    r_blk = r_blk.at[half:, :half].set(-jnp.eye(half, dtype=jnp.float32))
    r_blk = r_blk.at[:half, half:].set(jnp.eye(half, dtype=jnp.float32))
    R = jnp.kron(jnp.eye(NH, dtype=jnp.float32), r_blk)              # [D, D]

    wqkv = jnp.concatenate([wq_s, wq_s @ R, wk_e, wk_e @ R, wv_e], axis=1)
    wqkv = wqkv.astype(jnp.bfloat16)                     # [H, 5*D], bf16 for MXU
    wo_b = wo.astype(jnp.bfloat16)                       # [D, H]

    # RoPE tables tiled over heads (lanes) and batch (rows ordered b-major).
    cos_full = jnp.tile(cos, (batch, NH)).astype(jnp.float32)        # [B*S, D]
    sin_full = jnp.tile(sin, (batch, NH)).astype(jnp.float32)        # [B*S, D]

    # Additive attention bias over flattened (batch, seq) rows: causal within a
    # batch, fully masked across batches.
    idx = jnp.arange(S)
    causal = idx[None, :] <= idx[:, None]                            # [S, S]
    same_b = jnp.eye(batch, dtype=bool)
    mask = (same_b[:, None, :, None] & causal[None, :, None, :]
            ).reshape(batch * S, batch * S)
    bias = jnp.where(mask, 0.0, -1e30).astype(jnp.float32)
    return wqkv, wo_b, cos_full, sin_full, bias


# ------------------------------- wrapper ----------------------------------
@jax.jit
def attention_with_rope(x, wqkv, wo_b, cos_full, sin_full, bias):
    B, S, H = x.shape
    vmem = pl.BlockSpec(memory_space=pltpu.MemorySpace.VMEM)
    out2d = pl.pallas_call(
        attn_rope_kernel,
        out_shape=jax.ShapeDtypeStruct((B * S, H), x.dtype),
        in_specs=[vmem] * 6,
        out_specs=vmem,
    )(x.reshape(B * S, H), wqkv, wo_b, cos_full, sin_full, bias)
    return out2d.reshape(B, S, H)


# ------------------------- pure-JAX reference ------------------------------
def _ref_rotate_half(x):
    x1, x2 = jnp.split(x, 2, axis=-1)
    return jnp.concatenate([-x2, x1], axis=-1)


def reference_forward(x, wq, wk, wv, wo, cos, sin):
    B, S, H = x.shape
    q = x @ wq
    k = x @ wk
    v = x @ wv
    q = q.reshape(B, S, NUM_HEADS, HEAD_DIM).transpose(0, 2, 1, 3)
    k = k.reshape(B, S, KV_HEADS, HEAD_DIM).transpose(0, 2, 1, 3)
    v = v.reshape(B, S, KV_HEADS, HEAD_DIM).transpose(0, 2, 1, 3)
    q = q.astype(jnp.float32) * cos + _ref_rotate_half(q.astype(jnp.float32)) * sin
    k = k.astype(jnp.float32) * cos + _ref_rotate_half(k.astype(jnp.float32)) * sin
    k = jnp.repeat(k, KV_GROUPS, axis=1)
    v = jnp.repeat(v, KV_GROUPS, axis=1)
    scale = 1.0 / math.sqrt(HEAD_DIM)
    s = jnp.einsum("bhqd,bhkd->bhqk", q, k) * scale
    mask = jnp.tril(jnp.ones((S, S), dtype=bool))
    s = jnp.where(mask, s, -jnp.inf)
    p = jax.nn.softmax(s, axis=-1)
    o = jnp.einsum("bhqk,bhkd->bhqd", p, v)
    o = o.transpose(0, 2, 1, 3).reshape(B, S, H)
    return o @ wo


# --------------------------------- main ------------------------------------
if __name__ == "__main__":
    key = jax.random.PRNGKey(0)
    kx, kq, kk, kv, ko = jax.random.split(key, 5)

    x = jax.random.normal(kx, (BATCH, SEQ, HIDDEN), dtype=jnp.float32)
    # deterministic synthetic weights, stored as [in, out]
    wq = jax.random.normal(kq, (HIDDEN, HIDDEN), dtype=jnp.float32) * 0.05
    wk = jax.random.normal(kk, (HIDDEN, KV_DIM), dtype=jnp.float32) * 0.05
    wv = jax.random.normal(kv, (HIDDEN, KV_DIM), dtype=jnp.float32) * 0.05
    wo = jax.random.normal(ko, (HIDDEN, HIDDEN), dtype=jnp.float32) * 0.05

    # standard RoPE cos/sin tables: [S, head_dim]
    pos = jnp.arange(SEQ, dtype=jnp.float32)
    inv_freq = 1.0 / (10000.0 ** (jnp.arange(0, HEAD_DIM, 2, dtype=jnp.float32) / HEAD_DIM))
    angles = jnp.outer(pos, inv_freq)                                    # [S, hd/2]
    cos = jnp.concatenate([jnp.cos(angles), jnp.cos(angles)], axis=-1)   # [S, hd]
    sin = jnp.concatenate([jnp.sin(angles), jnp.sin(angles)], axis=-1)   # [S, hd]

    # One-time param prep (init), then the call itself is just the kernel.
    params = prepare_params(wq, wk, wv, wo, cos, sin, BATCH)

    out = attention_with_rope(x, *params)
    out = jax.block_until_ready(out)

    ref = reference_forward(x, wq, wk, wv, wo, cos, sin)
    assert out.shape == (BATCH, SEQ, HIDDEN)
    # tolerance bounds bf16-operand rounding in the three MXU stages; all
    # element-wise math (RoPE, softmax) is f32 and the softmax normalization
    # uses an exact reciprocal.
    assert jnp.allclose(out, ref, rtol=1e-2, atol=1e-2), (
        f"max err {jnp.max(jnp.abs(out - ref))}")

    print("KERNEL_OK")
</pallas_src>

<mosaic_0001>
module attributes {stable_mosaic.version = 11 : i64} {
  func.func @attn_rope_kernel(%arg0: memref<16x32xf32, #tpu.memory_space<vmem>>, %arg1: memref<32x160xbf16, #tpu.memory_space<vmem>>, %arg2: memref<32x32xbf16, #tpu.memory_space<vmem>>, %arg3: memref<16x32xf32, #tpu.memory_space<vmem>>, %arg4: memref<16x32xf32, #tpu.memory_space<vmem>>, %arg5: memref<16x16xf32, #tpu.memory_space<vmem>>, %arg6: memref<16x32xf32, #tpu.memory_space<vmem>>) attributes {dimension_semantics = [], scalar_prefetch = 0 : i64, scratch_operands = 0 : i64, tpu.core_type = #tpu.core_type<tc>} {
    %c0 = arith.constant 0 : index
    %c0_0 = arith.constant 0 : index
    %0 = vector.load %arg0[%c0, %c0_0] : memref<16x32xf32, #tpu.memory_space<vmem>>, vector<16x32xf32>
    %1 = arith.truncf %0 : vector<16x32xf32> to vector<16x32xbf16>
    %c0_1 = arith.constant 0 : index
    %c0_2 = arith.constant 0 : index
    %2 = vector.load %arg1[%c0_1, %c0_2] : memref<32x160xbf16, #tpu.memory_space<vmem>>, vector<32x160xbf16>
    %cst = arith.constant dense<0.000000e+00> : vector<16x160xf32>
    %3 = tpu.matmul %1, %2, %cst {dimension_numbers = #tpu.dot_dimension_numbers<[1], [0], [0], [1], [0, 0, 1, 1], [], []>} : vector<16x32xbf16>, vector<32x160xbf16>, vector<16x160xf32> -> vector<16x160xf32>
    %4 = vector.extract_strided_slice %3 {offsets = [0, 0], sizes = [16, 32], strides = [1, 1]} : vector<16x160xf32> to vector<16x32xf32>
    %5 = vector.extract_strided_slice %3 {offsets = [0, 32], sizes = [16, 32], strides = [1, 1]} : vector<16x160xf32> to vector<16x32xf32>
    %6 = vector.extract_strided_slice %3 {offsets = [0, 64], sizes = [16, 32], strides = [1, 1]} : vector<16x160xf32> to vector<16x32xf32>
    %7 = vector.extract_strided_slice %3 {offsets = [0, 96], sizes = [16, 32], strides = [1, 1]} : vector<16x160xf32> to vector<16x32xf32>
    %8 = vector.extract_strided_slice %3 {offsets = [0, 128], sizes = [16, 32], strides = [1, 1]} : vector<16x160xf32> to vector<16x32xf32>
    %c0_3 = arith.constant 0 : index
    %c0_4 = arith.constant 0 : index
    %9 = vector.load %arg3[%c0_3, %c0_4] : memref<16x32xf32, #tpu.memory_space<vmem>>, vector<16x32xf32>
    %c0_5 = arith.constant 0 : index
    %c0_6 = arith.constant 0 : index
    %10 = vector.load %arg4[%c0_5, %c0_6] : memref<16x32xf32, #tpu.memory_space<vmem>>, vector<16x32xf32>
    %11 = arith.mulf %4, %9 : vector<16x32xf32>
    %12 = arith.mulf %5, %10 : vector<16x32xf32>
    %13 = arith.addf %11, %12 : vector<16x32xf32>
    %14 = arith.mulf %6, %9 : vector<16x32xf32>
    %15 = arith.mulf %7, %10 : vector<16x32xf32>
    %16 = arith.addf %14, %15 : vector<16x32xf32>
    %c0_7 = arith.constant 0 : index
    %c0_8 = arith.constant 0 : index
    %17 = vector.load %arg5[%c0_7, %c0_8] : memref<16x16xf32, #tpu.memory_space<vmem>>, vector<16x16xf32>
    %18 = arith.truncf %13 : vector<16x32xf32> to vector<16x32xbf16>
    %19 = arith.truncf %16 : vector<16x32xf32> to vector<16x32xbf16>
    %20 = arith.truncf %8 : vector<16x32xf32> to vector<16x32xbf16>
    %21 = vector.extract_strided_slice %18 {offsets = [0, 0], sizes = [16, 8], strides = [1, 1]} : vector<16x32xbf16> to vector<16x8xbf16>
    %22 = vector.extract_strided_slice %19 {offsets = [0, 0], sizes = [16, 8], strides = [1, 1]} : vector<16x32xbf16> to vector<16x8xbf16>
    "tpu.trace_start"() <{level = 10 : i32, message = "qd,kd->qk"}> : () -> ()
    %cst_9 = arith.constant dense<0.000000e+00> : vector<16x16xf32>
    %23 = tpu.matmul %21, %22, %cst_9 {dimension_numbers = #tpu.dot_dimension_numbers<[1], [1], [0], [0], [0, 0, 1, 0], [], []>} : vector<16x8xbf16>, vector<16x8xbf16>, vector<16x16xf32> -> vector<16x16xf32>
    "tpu.trace_stop"() : () -> ()
    %24 = arith.addf %23, %17 : vector<16x16xf32>
    %cst_10 = arith.constant dense<0xFF800000> : vector<16xf32>
    %25 = vector.multi_reduction <maximumf>, %24, %cst_10 [1] : vector<16x16xf32> to vector<16xf32>
    %26 = vector.shape_cast %25 : vector<16xf32> to vector<16x1xf32>
    %27 = vector.broadcast %26 : vector<16x1xf32> to vector<16x16xf32>
    %28 = arith.subf %24, %27 : vector<16x16xf32>
    %29 = math.exp %28 : vector<16x16xf32>
    %cst_11 = arith.constant dense<0.000000e+00> : vector<16xf32>
    %30 = vector.multi_reduction <add>, %29, %cst_11 [1] : vector<16x16xf32> to vector<16xf32>
    %31 = vector.shape_cast %30 : vector<16xf32> to vector<16x1xf32>
    %cst_12 = arith.constant 1.000000e+00 : f32
    %32 = vector.broadcast %cst_12 : f32 to vector<16x1xf32>
    %33 = arith.divf %32, %31 : vector<16x1xf32>
    %34 = arith.truncf %29 : vector<16x16xf32> to vector<16x16xbf16>
    %35 = vector.extract_strided_slice %20 {offsets = [0, 0], sizes = [16, 8], strides = [1, 1]} : vector<16x32xbf16> to vector<16x8xbf16>
    %cst_13 = arith.constant dense<0.000000e+00> : vector<16x8xf32>
    %36 = tpu.matmul %34, %35, %cst_13 {dimension_numbers = #tpu.dot_dimension_numbers<[1], [0], [0], [1], [0, 0, 1, 1], [], []>} : vector<16x16xbf16>, vector<16x8xbf16>, vector<16x8xf32> -> vector<16x8xf32>
    %37 = vector.broadcast %33 : vector<16x1xf32> to vector<16x8xf32>
    %38 = arith.mulf %36, %37 : vector<16x8xf32>
    %39 = vector.extract_strided_slice %18 {offsets = [0, 8], sizes = [16, 8], strides = [1, 1]} : vector<16x32xbf16> to vector<16x8xbf16>
    %40 = vector.extract_strided_slice %19 {offsets = [0, 8], sizes = [16, 8], strides = [1, 1]} : vector<16x32xbf16> to vector<16x8xbf16>
    "tpu.trace_start"() <{level = 10 : i32, message = "qd,kd->qk"}> : () -> ()
    %cst_14 = arith.constant dense<0.000000e+00> : vector<16x16xf32>
    %41 = tpu.matmul %39, %40, %cst_14 {dimension_numbers = #tpu.dot_dimension_numbers<[1], [1], [0], [0], [0, 0, 1, 0], [], []>} : vector<16x8xbf16>, vector<16x8xbf16>, vector<16x16xf32> -> vector<16x16xf32>
    "tpu.trace_stop"() : () -> ()
    %42 = arith.addf %41, %17 : vector<16x16xf32>
    %cst_15 = arith.constant dense<0xFF800000> : vector<16xf32>
    %43 = vector.multi_reduction <maximumf>, %42, %cst_15 [1] : vector<16x16xf32> to vector<16xf32>
    %44 = vector.shape_cast %43 : vector<16xf32> to vector<16x1xf32>
    %45 = vector.broadcast %44 : vector<16x1xf32> to vector<16x16xf32>
    %46 = arith.subf %42, %45 : vector<16x16xf32>
    %47 = math.exp %46 : vector<16x16xf32>
    %cst_16 = arith.constant dense<0.000000e+00> : vector<16xf32>
    %48 = vector.multi_reduction <add>, %47, %cst_16 [1] : vector<16x16xf32> to vector<16xf32>
    %49 = vector.shape_cast %48 : vector<16xf32> to vector<16x1xf32>
    %cst_17 = arith.constant 1.000000e+00 : f32
    %50 = vector.broadcast %cst_17 : f32 to vector<16x1xf32>
    %51 = arith.divf %50, %49 : vector<16x1xf32>
    %52 = arith.truncf %47 : vector<16x16xf32> to vector<16x16xbf16>
    %53 = vector.extract_strided_slice %20 {offsets = [0, 8], sizes = [16, 8], strides = [1, 1]} : vector<16x32xbf16> to vector<16x8xbf16>
    %cst_18 = arith.constant dense<0.000000e+00> : vector<16x8xf32>
    %54 = tpu.matmul %52, %53, %cst_18 {dimension_numbers = #tpu.dot_dimension_numbers<[1], [0], [0], [1], [0, 0, 1, 1], [], []>} : vector<16x16xbf16>, vector<16x8xbf16>, vector<16x8xf32> -> vector<16x8xf32>
    %55 = vector.broadcast %51 : vector<16x1xf32> to vector<16x8xf32>
    %56 = arith.mulf %54, %55 : vector<16x8xf32>
    %57 = vector.extract_strided_slice %18 {offsets = [0, 16], sizes = [16, 8], strides = [1, 1]} : vector<16x32xbf16> to vector<16x8xbf16>
    %58 = vector.extract_strided_slice %19 {offsets = [0, 16], sizes = [16, 8], strides = [1, 1]} : vector<16x32xbf16> to vector<16x8xbf16>
    "tpu.trace_start"() <{level = 10 : i32, message = "qd,kd->qk"}> : () -> ()
    %cst_19 = arith.constant dense<0.000000e+00> : vector<16x16xf32>
    %59 = tpu.matmul %57, %58, %cst_19 {dimension_numbers = #tpu.dot_dimension_numbers<[1], [1], [0], [0], [0, 0, 1, 0], [], []>} : vector<16x8xbf16>, vector<16x8xbf16>, vector<16x16xf32> -> vector<16x16xf32>
    "tpu.trace_stop"() : () -> ()
    %60 = arith.addf %59, %17 : vector<16x16xf32>
    %cst_20 = arith.constant dense<0xFF800000> : vector<16xf32>
    %61 = vector.multi_reduction <maximumf>, %60, %cst_20 [1] : vector<16x16xf32> to vector<16xf32>
    %62 = vector.shape_cast %61 : vector<16xf32> to vector<16x1xf32>
    %63 = vector.broadcast %62 : vector<16x1xf32> to vector<16x16xf32>
    %64 = arith.subf %60, %63 : vector<16x16xf32>
    %65 = math.exp %64 : vector<16x16xf32>
    %cst_21 = arith.constant dense<0.000000e+00> : vector<16xf32>
    %66 = vector.multi_reduction <add>, %65, %cst_21 [1] : vector<16x16xf32> to vector<16xf32>
    %67 = vector.shape_cast %66 : vector<16xf32> to vector<16x1xf32>
    %cst_22 = arith.constant 1.000000e+00 : f32
    %68 = vector.broadcast %cst_22 : f32 to vector<16x1xf32>
    %69 = arith.divf %68, %67 : vector<16x1xf32>
    %70 = arith.truncf %65 : vector<16x16xf32> to vector<16x16xbf16>
    %71 = vector.extract_strided_slice %20 {offsets = [0, 16], sizes = [16, 8], strides = [1, 1]} : vector<16x32xbf16> to vector<16x8xbf16>
    %cst_23 = arith.constant dense<0.000000e+00> : vector<16x8xf32>
    %72 = tpu.matmul %70, %71, %cst_23 {dimension_numbers = #tpu.dot_dimension_numbers<[1], [0], [0], [1], [0, 0, 1, 1], [], []>} : vector<16x16xbf16>, vector<16x8xbf16>, vector<16x8xf32> -> vector<16x8xf32>
    %73 = vector.broadcast %69 : vector<16x1xf32> to vector<16x8xf32>
    %74 = arith.mulf %72, %73 : vector<16x8xf32>
    %75 = vector.extract_strided_slice %18 {offsets = [0, 24], sizes = [16, 8], strides = [1, 1]} : vector<16x32xbf16> to vector<16x8xbf16>
    %76 = vector.extract_strided_slice %19 {offsets = [0, 24], sizes = [16, 8], strides = [1, 1]} : vector<16x32xbf16> to vector<16x8xbf16>
    "tpu.trace_start"() <{level = 10 : i32, message = "qd,kd->qk"}> : () -> ()
    %cst_24 = arith.constant dense<0.000000e+00> : vector<16x16xf32>
    %77 = tpu.matmul %75, %76, %cst_24 {dimension_numbers = #tpu.dot_dimension_numbers<[1], [1], [0], [0], [0, 0, 1, 0], [], []>} : vector<16x8xbf16>, vector<16x8xbf16>, vector<16x16xf32> -> vector<16x16xf32>
    "tpu.trace_stop"() : () -> ()
    %78 = arith.addf %77, %17 : vector<16x16xf32>
    %cst_25 = arith.constant dense<0xFF800000> : vector<16xf32>
    %79 = vector.multi_reduction <maximumf>, %78, %cst_25 [1] : vector<16x16xf32> to vector<16xf32>
    %80 = vector.shape_cast %79 : vector<16xf32> to vector<16x1xf32>
    %81 = vector.broadcast %80 : vector<16x1xf32> to vector<16x16xf32>
    %82 = arith.subf %78, %81 : vector<16x16xf32>
    %83 = math.exp %82 : vector<16x16xf32>
    %cst_26 = arith.constant dense<0.000000e+00> : vector<16xf32>
    %84 = vector.multi_reduction <add>, %83, %cst_26 [1] : vector<16x16xf32> to vector<16xf32>
    %85 = vector.shape_cast %84 : vector<16xf32> to vector<16x1xf32>
    %cst_27 = arith.constant 1.000000e+00 : f32
    %86 = vector.broadcast %cst_27 : f32 to vector<16x1xf32>
    %87 = arith.divf %86, %85 : vector<16x1xf32>
    %88 = arith.truncf %83 : vector<16x16xf32> to vector<16x16xbf16>
    %89 = vector.extract_strided_slice %20 {offsets = [0, 24], sizes = [16, 8], strides = [1, 1]} : vector<16x32xbf16> to vector<16x8xbf16>
    %cst_28 = arith.constant dense<0.000000e+00> : vector<16x8xf32>
    %90 = tpu.matmul %88, %89, %cst_28 {dimension_numbers = #tpu.dot_dimension_numbers<[1], [0], [0], [1], [0, 0, 1, 1], [], []>} : vector<16x16xbf16>, vector<16x8xbf16>, vector<16x8xf32> -> vector<16x8xf32>
    %91 = vector.broadcast %87 : vector<16x1xf32> to vector<16x8xf32>
    %92 = arith.mulf %90, %91 : vector<16x8xf32>
    %93 = tpu.concatenate %38, %56, %74, %92 in 1 : vector<16x8xf32>, vector<16x8xf32>, vector<16x8xf32>, vector<16x8xf32> -> vector<16x32xf32>
    %94 = arith.truncf %93 : vector<16x32xf32> to vector<16x32xbf16>
    %c0_29 = arith.constant 0 : index
    %c0_30 = arith.constant 0 : index
    %95 = vector.load %arg2[%c0_29, %c0_30] : memref<32x32xbf16, #tpu.memory_space<vmem>>, vector<32x32xbf16>
    %cst_31 = arith.constant dense<0.000000e+00> : vector<16x32xf32>
    %96 = tpu.matmul %94, %95, %cst_31 {dimension_numbers = #tpu.dot_dimension_numbers<[1], [0], [0], [1], [0, 0, 1, 1], [], []>} : vector<16x32xbf16>, vector<32x32xbf16>, vector<16x32xf32> -> vector<16x32xf32>
    %c0_32 = arith.constant 0 : index
    %c0_33 = arith.constant 0 : index
    %97 = vector.load %arg6[%c0_32, %c0_33] : memref<16x32xf32, #tpu.memory_space<vmem>>, vector<16x32xf32>
    tpu.vector_store %arg6[%c0_32, %c0_33], %96 {strides = array<i32>} : memref<16x32xf32, #tpu.memory_space<vmem>>, vector<16x32xf32>,
    return
  }
}

</mosaic_0001>

<bundles_post_ra>
// kernel: attention_with_rope.1
= control target key start
LH: loop header
LB: loop body
LE: loop exit
PB: predicated region body
PF: predicated region fallthrough
CT: control target
= control target key end

     0   :  { %11 = vsyncpa [#allocation3], 0  ;;  %s1356_s0 = inlined_call_operand.hbm [shape: f32[16,32], index: 0, kind: input, shape index: {}]   ;;  %s1357_s1 = inlined_call_operand.hbm [shape: bf16[32,160], index: 1, kind: input, shape index: {}]   ;;  %s1358_s2 = inlined_call_operand.hbm [shape: bf16[32,32], index: 2, kind: input, shape index: {}]   ;;  %s1359_s3 = inlined_call_operand.hbm [shape: f32[16,32], index: 3, kind: input, shape index: {}]   ;;  %s1360_s4 = inlined_call_operand.hbm [shape: f32[16,32], index: 4, kind: input, shape index: {}]   ;;  %s1361_s5 = inlined_call_operand.hbm [shape: f32[16,16], index: 5, kind: input, shape index: {}]   ;;  %s1362_s6 = inlined_call_operand.hbm [shape: f32[16,32], index: 6, kind: output, shape index: {}]  }
   0x1   :  { %12 = vsyncpa [#allocation6], 0 }
   0x2   :  { %13 = vsyncpa [#allocation9], 0 }
   0x3   :  { %14 = vsyncpa [#allocation12], 0 }
   0x4   :  { %15 = vsyncpa [#allocation4], 0  ;;  %s1166_s21 = smov [#allocation5]   ;;  %s1167_s23 = smov [#allocation8]  }
   0x5   :  { %s33_s22 = sshll.u32 %s1166_s21, 4  ;;  %s57_s24 = sshll.u32 %s1167_s23, 4  ;;  %s34_s22 = int_to_ptr.vmem [resolvable:$true] %s33_s22  ;;  %s58_s24 = int_to_ptr.vmem [resolvable:$true] %s57_s24 }
   0x6   :  { %s1024_s25 = scalar_lea.vmem %s34_s22, 512  ;;  %p1029_p1 = scmp.lt.s32.totalorder %s34_s22, %s34_s22 }
   0x7   :  { %p1025_p0 = scmp.ne.s32.totalorder %s34_s22, %s1024_s25  ;;  %p1030_p2 = scmp.lt.s32.totalorder %s1024_s25, %s1024_s25 }
   0x9   :  { %p1031_p3 = por %p1030_p2, %p1029_p1 }
   0xb   :  { %p1032_p4 = pnand %p1031_p3, %p1025_p0 }
   0xd   :  { %1035 = shalt.err (!%p1032_p4)
}
   0xe   :  { %s1168_s26 = smov 128   ;;  %s1169_s27 = smov 8  }
   0xf   :  { %39 = dma.hbm_to_vmem [thread:$0]  %s1357_s1, 512, %s34_s22, [#allocation6], %s1168_s26, %s1168_s26, %s1169_s27  }
  0x10   :  { %s1044_s30 = scalar_lea.vmem %s58_s24, 256  ;;  %p1049_p6 = scmp.lt.s32.totalorder %s58_s24, %s58_s24 }
  0x11   :  { %p1045_p5 = scmp.ne.s32.totalorder %s58_s24, %s1044_s30  ;;  %p1050_p7 = scmp.lt.s32.totalorder %s1044_s30, %s1044_s30 }
  0x13   :  { %p1051_p8 = por %p1050_p7, %p1049_p6 }
  0x15   :  { %p1052_p9 = pnand %p1051_p8, %p1045_p5 }
  0x17   :  { %1055 = shalt.err (!%p1052_p9)
}
  0x18   :  { %63 = dma.hbm_to_vmem [thread:$0]  %s1359_s3, 256, %s58_s24, [#allocation9], %s1168_s26, %s1168_s26, %s1169_s27  }
  0x19   :  { %s1170_s9 = smov [#allocation2]   ;;  %s1171_s11 = smov [#allocation7]  }
  0x1a   :  { %s21_s10 = sshll.u32 %s1170_s9, 4  ;;  %s45_s12 = sshll.u32 %s1171_s11, 4  ;;  %s22_s10 = int_to_ptr.vmem [resolvable:$true] %s21_s10  ;;  %s46_s12 = int_to_ptr.vmem [resolvable:$true] %s45_s12 }
  0x1b   :  { %s1064_s1 = scalar_lea.vmem %s22_s10, 256  ;;  %p1069_p11 = scmp.lt.s32.totalorder %s22_s10, %s22_s10 }
  0x1c   :  { %p1065_p10 = scmp.ne.s32.totalorder %s22_s10, %s1064_s1  ;;  %p1070_p12 = scmp.lt.s32.totalorder %s1064_s1, %s1064_s1 }
  0x1e   :  { %p1071_p13 = por %p1070_p12, %p1069_p11 }
  0x20   :  { %p1072_p0 = pnand %p1071_p13, %p1065_p10 }
  0x22   :  { %1075 = shalt.err (!%p1072_p0)
}
  0x23   :  { %27 = dma.hbm_to_vmem [thread:$0]  %s1356_s0, 256, %s22_s10, [#allocation3], %s1168_s26, %s1168_s26, %s1169_s27  }
  0x24   :  { %s1084_s3 = scalar_lea.vmem %s46_s12, 256  ;;  %p1089_p2 = scmp.lt.s32.totalorder %s46_s12, %s46_s12 }
  0x25   :  { %p1085_p1 = scmp.ne.s32.totalorder %s46_s12, %s1084_s3  ;;  %p1090_p3 = scmp.lt.s32.totalorder %s1084_s3, %s1084_s3 }
  0x27   :  { %p1091_p4 = por %p1090_p3, %p1089_p2 }
  0x29   :  { %p1092_p5 = pnand %p1091_p4, %p1085_p1 }
  0x2b   :  { %1095 = shalt.err (!%p1092_p5)
}
  0x2c   :  { %s1172_s15 = smov 64   ;;  %s1173_s16 = smov 4  }
  0x2d   :  { %51 = dma.hbm_to_vmem [thread:$0]  %s1358_s2, 256, %s46_s12, [#allocation6], %s1172_s15, %s1172_s15, %s1173_s16  }
  0x2e   :  { %s1174_s19 = smov [#allocation10]   ;;  %s1175_s21 = smov [#allocation11]  }
  0x2f   :  { %s69_s20 = sshll.u32 %s1174_s19, 4  ;;  %s81_s22 = sshll.u32 %s1175_s21, 4  ;;  %s70_s20 = int_to_ptr.vmem [resolvable:$true] %s69_s20  ;;  %s82_s22 = int_to_ptr.vmem [resolvable:$true] %s81_s22 }
  0x30   :  { %s1104_s0 = scalar_lea.vmem %s70_s20, 256  ;;  %p1109_p7 = scmp.lt.s32.totalorder %s70_s20, %s70_s20 }
  0x31   :  { %p1105_p6 = scmp.ne.s32.totalorder %s70_s20, %s1104_s0  ;;  %p1110_p8 = scmp.lt.s32.totalorder %s1104_s0, %s1104_s0 }
  0x33   :  { %p1111_p9 = por %p1110_p8, %p1109_p7 }
  0x35   :  { %p1112_p10 = pnand %p1111_p9, %p1105_p6 }
  0x37   :  { %1115 = shalt.err (!%p1112_p10)
}
  0x38   :  { %75 = dma.hbm_to_vmem [thread:$0]  %s1360_s4, 256, %s70_s20, [#allocation9], %s1168_s26, %s1168_s26, %s1169_s27  }
  0x39   :  { %s1124_s2 = scalar_lea.vmem %s82_s22, 256  ;;  %p1129_p12 = scmp.lt.s32.totalorder %s82_s22, %s82_s22 }
  0x3a   :  { %p1125_p11 = scmp.ne.s32.totalorder %s82_s22, %s1124_s2  ;;  %p1130_p13 = scmp.lt.s32.totalorder %s1124_s2, %s1124_s2 }
  0x3c   :  { %p1131_p0 = por %p1130_p13, %p1129_p12 }
  0x3e   :  { %p1132_p1 = pnand %p1131_p0, %p1125_p11 }
  0x40   :  { %1135 = shalt.err (!%p1132_p1)
}
  0x41   :  { %87 = dma.hbm_to_vmem [thread:$0]  %s1361_s5, 256, %s82_s22, [#allocation12], %s1168_s26, %s1168_s26, %s1169_s27  }
  0x42   :  { %1156 = dma.done.wait [#allocation3], 256  }
  0x43   :  { %1157 = vsyncadd [#allocation3], 4294967040 }
  0x44   :  { %1158 = dma.done.wait [#allocation6], 768  }
  0x45   :  { %1159 = vsyncadd [#allocation6], 4294966528 }
  0x46   :  { %1160 = dma.done.wait [#allocation9], 512  }
  0x47   :  { %1161 = vsyncadd [#allocation9], 4294966784 }
  0x48   :  { %1162 = dma.done.wait [#allocation12], 256  }
  0x49   :  { %1163 = vsyncadd [#allocation12], 4294967040  ;;  %v1176_v0 = vmov 0   ;;  %v976_v1 = vld [vmem:[#allocation5 + $0x14] ss:$8 sps:$4 sm:$0xff]   ;;  %v183_v7 = vld [vmem:[#allocation10] sm:$0xff] }
  0x4a   :  { %170 = vmatprep.mubr.bf16.mxu0 %v1176_v0  ;;  %v978_v2 = vld [vmem:[#allocation5 + $0x10] ss:$8 sps:$4 sm:$0xff]   ;;  %150 = vmatprep.subr.bf16.mxu0 %v976_v1  ;;  %v979_v3 = vld [vmem:[#allocation5 + $0x4] ss:$8 sps:$4 sm:$0xff]   ;;  %v981_v4 = vld [vmem:[#allocation5] ss:$8 sps:$4 sm:$0xff]  }
  0x4b   :  { %151 = vmatpush1.bf16.msra.mxu0 %v978_v2  ;;  %v107_v5 = vld [vmem:[#allocation2] sm:$0xff]  ;;  %v108_v6 = vld [vmem:[#allocation2 + $0x8] sm:$0xff]  ;;  %s1177_s4 = smov 96   ;;  %v184_v8 = vld [vmem:[#allocation10 + $0x8] sm:$0xff]  ;;  %s1178_s5 = smov 32   ;;  %vm134_vm0 = vcmask 261120  }
  0x4c   :  { %152 = vmatprep.subr.bf16.mxu0 %v979_v3  ;;  %217 = vrot.lane.b32.xlu0 %v183_v7, %s1177_s4  ;;  %v109_v9 = vpack.c.bf16 %v108_v6, %v107_v5  ;;  %v181_v10 = vld [vmem:[#allocation8] sm:$0xff]  ;;  %v182_v11 = vld [vmem:[#allocation8 + $0x8] sm:$0xff]  ;;  %v1179_v12 = vmov 0.0   ;;  %vm1180_vm1 = vmmov 0   ;;  %s1181_s29 = smov 56   ;;  %s1182_s30 = smov 48  }
  0x4d   :  { %189 = vrot.lane.b32.xlu1 %v183_v7, %s1178_s5  ;;  %881 = vmatprep.subr.bf16.mxu1 %v1179_v12  ;;  %s1183_s7 = smov 120   ;;  %s1184_s8 = smov 40   ;;  %vm243_vm2 = vcmask 64512   ;;  %v235_v53 = vld [vmem:[#allocation11] sm:$0xff]  ;;  %vm291_vm3 = vcmask 130048   ;;  %v236_v57 = vld [vmem:[#allocation11 + $0x8] sm:$0xff] }
  0x4e   :  { %883 = vmatprep.mubr.msk.bf16.mxu1 %vm1180_vm1, %v1179_v12  ;;  %s1185_s9 = smov 112   ;;  %s1186_s10 = smov 104   ;;  %vm760_vm4 = vcmask 195584  }
  0x4f   :  { %153 = vmatpush1.bf16.msra.mxu0 %v981_v4  ;;  %s1187_s11 = smov 16   ;;  %s1188_s12 = smov 24  }
  0x50   :  { %219 = vrot.lane.b32.xlu0 %v184_v8, %s1177_s4  ;;  %887 = vmatprep.subr.bf16.mxu0 %v1179_v12  ;;  %s1189_s1 = smov [#allocation13]  }
  0x51   :  { %191 = vrot.lane.b32.xlu1 %v184_v8, %s1178_s5  ;;  %s831_s13 = sshll.u32 %s1189_s1, 4  ;;  %s832_s13 = int_to_ptr.vmem [resolvable:$true] %s831_s13 }
  0x52   :  { %850 = vmatmul.mubr.msk.bf16.vlgmr.msra.gmra.mxu0 %vm134_vm0, %v109_v9  ;;  %s1136_s14 = scalar_lea.vmem %s832_s13, 256  ;;  %p1141_p3 = scmp.lt.s32.totalorder %s832_s13, %s832_s13 }
  0x53   :  { %889 = vmatprep.mubr.msk.bf16.mxu0 %vm1180_vm1, %v1179_v12  ;;  %p1137_p2 = scmp.ne.s32.totalorder %s832_s13, %s1136_s14  ;;  %p1142_p4 = scmp.lt.s32.totalorder %s1136_s14, %s1136_s14 }
  0x54   :  { %209 = vrot.lane.b32.xlu0 %v181_v10, %s1172_s15 }
  0x55   :  { %211 = vrot.lane.b32.xlu1 %v182_v11, %s1172_s15  ;;  %p1143_p5 = por %p1142_p4, %p1141_p3 }
  0x57   :  { %p1144_p6 = pnand %p1143_p5, %p1137_p2 }
  0xbe   :  { %v218_v13 = vpop.permute.xlu0 %217 }
  0xbf   :  { %v190_v16 = vpop.permute.xlu1 %189 }
  0xc2   :  { %v220_v18 = vpop.permute.xlu0 %219 }
  0xc3   :  { %v192_v24 = vpop.permute.xlu1 %191 }
  0xc6   :  { %v210_v26 = vpop.permute.xlu0 %209 }
  0xc7   :  { %v212_v27 = vpop.permute.xlu1 %211 }
 0x112   :  { %v172_v14 = vpop.f32.mrf.mxu0 }
 0x113   :  { %v223_v15 = vmul.f32 %v218_v13, %v172_v14  ;;  %v195_v20 = vmul.f32 %v190_v16, %v172_v14  ;;  %v215_v29 = vmul.f32 %v210_v26, %v172_v14  ;;  %v185_v35 = vmul.f32 %v181_v10, %v172_v14 }
 0x114   :  { %v174_v17 = vpop.f32.mrf.mxu0 }
 0x115   :  { %227 = vrot.lane.b32.xlu0 %v223_v15, %s1177_s4 }
 0x116   :  { %v176_v19 = vpop.f32.mrf.mxu0 }
 0x117   :  { %v224_v21 = vmul.f32 %v220_v18, %v176_v19  ;;  %v196_v25 = vmul.f32 %v192_v24, %v176_v19  ;;  %v216_v30 = vmul.f32 %v212_v27, %v176_v19  ;;  %v186_v37 = vmul.f32 %v182_v11, %v176_v19 }
 0x118   :  { %v178_v22 = vpop.f32.mrf.mxu0 }
 0x119   :  { %v1268_v23 = vpack.c.bf16 %v178_v22, %v174_v17  ;;  %199 = vrot.lane.b32.xlu0 %v195_v20, %s1177_s4  ;;  %229 = vrot.lane.b32.xlu1 %v224_v21, %s1177_s4 }
 0x11b   :  { %888 = vmatpush3.bf16.msra.mxu0 %v1268_v23 }
 0x11c   :  { %899 = vmatprep.subr.bf16.mxu0 %v1179_v12 }
 0x11d   :  { %201 = vrot.lane.b32.xlu1 %v196_v25, %s1177_s4 }
 0x187   :  { %v228_v28 = vpop.permute.xlu0 %227 }
 0x188   :  { %v233_v32 = vadd.f32 %v228_v28, %v215_v29 }
 0x18b   :  { %v230_v31 = vpop.permute.xlu1 %229  ;;  %v200_v34 = vpop.permute.xlu0 %199 }
 0x18c   :  { %v234_v33 = vadd.f32 %v230_v31, %v216_v30  ;;  %v205_v39 = vadd.f32 %v200_v34, %v185_v35 }
 0x18e   :  { %v238_v36 = vpack.c.bf16 %v234_v33, %v233_v32 }
 0x18f   :  { %v202_v38 = vpop.permute.xlu1 %201 }
 0x190   :  { %v206_v40 = vadd.f32 %v202_v38, %v186_v37  ;;  %241 = vrot.lane.b32.xlu0 %v238_v36, %s1172_s15  ;;  %364 = vrot.lane.b32.xlu1 %v238_v36, %s1181_s29 }
 0x192   :  { %v237_v41 = vpack.c.bf16 %v206_v40, %v205_v39 }
 0x194   :  { %488 = vrot.lane.b32.xlu1 %v238_v36, %s1182_s30  ;;  %362 = vrot.lane.b32.xlu0 %v237_v41, %s1183_s7 }
 0x198   :  { %611 = vrot.lane.b32.xlu1 %v238_v36, %s1184_s8  ;;  %486 = vrot.lane.b32.xlu0 %v237_v41, %s1185_s9 }
 0x19c   :  { %609 = vrot.lane.b32.xlu0 %v237_v41, %s1186_s10 }
 0x202   :  { %v242_v42 = vpop.permute.xlu0 %241  ;;  %v365_v44 = vpop.permute.xlu1 %364 }
 0x203   :  { %v248_v43 = vsel %vm243_vm2, %v242_v42, 0  ;;  %v370_v45 = vsel %vm243_vm2, %v365_v44, 0 }
 0x204   :  { %882 = vmatpush3.bf16.xpose.msra.mxu1 %v248_v43 }
 0x205   :  { %893 = vmatprep.subr.bf16.mxu1 %v1179_v12 }
 0x206   :  { %v489_v46 = vpop.permute.xlu1 %488  ;;  %v363_v47 = vpop.permute.xlu0 %362 }
 0x207   :  { %v494_v48 = vsel %vm243_vm2, %v489_v46, 0 }
 0x20a   :  { %v612_v49 = vpop.permute.xlu1 %611  ;;  %v487_v50 = vpop.permute.xlu0 %486 }
 0x20b   :  { %884 = vmatmul.mubr.msk.bf16.vlgmr.msra.gmra.mxu1 %vm243_vm2, %v237_v41  ;;  %v617_v51 = vsel %vm243_vm2, %v612_v49, 0 }
 0x20c   :  { %894 = vmatpush3.bf16.xpose.msra.mxu1 %v370_v45  ;;  %895 = vmatprep.mubr.msk.bf16.mxu1 %vm1180_vm1, %v1179_v12 }
 0x20d   :  { %905 = vmatprep.subr.bf16.mxu1 %v1179_v12 }
 0x20e   :  { %v610_v52 = vpop.permute.xlu0 %609 }
 0x213   :  { %896 = vmatmul.mubr.msk.bf16.vlgmr.msra.gmra.mxu1 %vm243_vm2, %v363_v47 }
 0x214   :  { %906 = vmatpush3.bf16.xpose.msra.mxu1 %v494_v48  ;;  %907 = vmatprep.mubr.msk.bf16.mxu1 %vm1180_vm1, %v1179_v12 }
 0x215   :  { %917 = vmatprep.subr.bf16.mxu1 %v1179_v12 }
 0x21b   :  { %908 = vmatmul.mubr.msk.bf16.vlgmr.msra.gmra.mxu1 %vm243_vm2, %v487_v50 }
 0x21c   :  { %918 = vmatpush3.bf16.xpose.msra.mxu1 %v617_v51  ;;  %919 = vmatprep.mubr.msk.bf16.mxu1 %vm1180_vm1, %v1179_v12 }
 0x21d   :  { %929 = vmatprep.subr.bf16.mxu1 %v1179_v12 }
 0x223   :  { %920 = vmatmul.mubr.msk.bf16.vlgmr.msra.gmra.mxu1 %vm243_vm2, %v610_v52 }
 0x224   :  { %933 = vmatprep.mubr.msk.bf16.mxu1 %vm1180_vm1, %v1179_v12 }
 0x2cb   :  { %v284_v54 = vpop.f32.mrf.mxu1 }
 0x2cc   :  { %v285_v55 = vadd.f32 %v284_v54, %v235_v53 }
 0x2cd   :  { %v885_v56 = vpop.f32.mrf.mxu1 }
 0x2ce   :  { %v292_v58 = vsel %vm291_vm3, %v285_v55, -inf }
 0x2cf   :  { %293 = vmax.xlane.f32.xlu1 %v292_v58  ;;  %v287_v59 = vpop.f32.mrf.mxu1 }
 0x2d0   :  { %v288_v60 = vadd.f32 %v287_v59, %v236_v57 }
 0x2d1   :  { %v886_v61 = vpop.f32.mrf.mxu1 }
 0x2d2   :  { %v295_v62 = vsel %vm291_vm3, %v288_v60, -inf }
 0x2d3   :  { %296 = vmax.xlane.f32.xlu0 %v295_v62  ;;  %v406_v63 = vpop.f32.mrf.mxu1 }
 0x2d4   :  { %v407_v0 = vadd.f32 %v406_v63, %v235_v53 }
 0x2d5   :  { %v897_v1 = vpop.f32.mrf.mxu1 }
 0x2d6   :  { %v413_v2 = vsel %vm291_vm3, %v407_v0, -inf }
 0x2d7   :  { %414 = vmax.xlane.f32.xlu0 %v413_v2  ;;  %v409_v3 = vpop.f32.mrf.mxu1 }
 0x2d8   :  { %v410_v4 = vadd.f32 %v409_v3, %v236_v57 }
 0x2d9   :  { %v898_v5 = vpop.f32.mrf.mxu1 }
 0x2da   :  { %v416_v6 = vsel %vm291_vm3, %v410_v4, -inf }
 0x2db   :  { %417 = vmax.xlane.f32.xlu1 %v416_v6  ;;  %v530_v7 = vpop.f32.mrf.mxu1 }
 0x2dc   :  { %v531_v8 = vadd.f32 %v530_v7, %v235_v53 }
 0x2dd   :  { %v909_v9 = vpop.f32.mrf.mxu1 }
 0x2de   :  { %v537_v10 = vsel %vm291_vm3, %v531_v8, -inf }
 0x2df   :  { %538 = vmax.xlane.f32.xlu0 %v537_v10  ;;  %v533_v11 = vpop.f32.mrf.mxu1 }
 0x2e0   :  { %v534_v13 = vadd.f32 %v533_v11, %v236_v57 }
 0x2e1   :  { %v910_v14 = vpop.f32.mrf.mxu1 }
 0x2e2   :  { %v540_v15 = vsel %vm291_vm3, %v534_v13, -inf }
 0x2e3   :  { %541 = vmax.xlane.f32.xlu1 %v540_v15  ;;  %v653_v16 = vpop.f32.mrf.mxu1 }
 0x2e4   :  { %v654_v17 = vadd.f32 %v653_v16, %v235_v53 }
 0x2e5   :  { %v921_v18 = vpop.f32.mrf.mxu1 }
 0x2e6   :  { %v660_v19 = vsel %vm291_vm3, %v654_v17, -inf }
 0x2e7   :  { %661 = vmax.xlane.f32.xlu0 %v660_v19  ;;  %v656_v20 = vpop.f32.mrf.mxu1 }
 0x2e8   :  { %v1314_v22 = vadd.f32 %v656_v20, %v236_v57 }
 0x2e9   :  { %v922_v21 = vpop.f32.mrf.mxu1 }
 0x2ea   :  { %v663_v24 = vsel %vm291_vm3, %v1314_v22, -inf }
 0x2f4   :  { %560 = vrot.lane.b32.xlu1 %v1268_v23, %s1185_s9 }
 0x2fd   :  { %437 = vrot.lane.b32.xlu0 %v1268_v23, %s1183_s7 }
 0x318   :  { %664 = vmax.xlane.f32.xlu1 %v663_v24 }
 0x329   :  { %683 = vrot.lane.b32.xlu1 %v1268_v23, %s1186_s10 }
 0x358   :  { %v294_v25 = vpop.xlane.xlu1 %293 }
 0x359   :  { %v298_v26 = vsub.f32 %v285_v55, %v294_v25  ;;  %v982_v25 = vld [vmem:[#allocation7 + $0x8] sm:$0xff]  }
 0x35a   :  { %930 = vmatpush3.bf16.msra.mxu1 %v982_v25 }
 0x35b   :  { %v300_v27 = vmul.f32 1.442695, %v298_v26  ;;  %931 = vmatprep.subr.bf16.mxu1 %v1179_v12 }
 0x35c   :  { %v297_v28 = vpop.xlane.xlu0 %296 }
 0x35d   :  { %v299_v29 = vsub.f32 %v288_v60, %v297_v28  ;;  %984 = vpow2.f32 %v300_v27 }
 0x35f   :  { %v302_v30 = vmul.f32 1.442695, %v299_v29 }
 0x360   :  { %v415_v31 = vpop.xlane.xlu0 %414 }
 0x361   :  { %986 = vpow2.f32 %v302_v30  ;;  %v419_v32 = vsub.f32 %v407_v0, %v415_v31 }
 0x363   :  { %v421_v33 = vmul.f32 1.442695, %v419_v32 }
 0x364   :  { %v418_v34 = vpop.xlane.xlu1 %417 }
 0x365   :  { %988 = vpow2.f32 %v421_v33  ;;  %v420_v35 = vsub.f32 %v410_v4, %v418_v34 }
 0x367   :  { %v423_v36 = vmul.f32 1.442695, %v420_v35 }
 0x368   :  { %v539_v37 = vpop.xlane.xlu0 %538 }
 0x369   :  { %990 = vpow2.f32 %v423_v36  ;;  %v543_v38 = vsub.f32 %v531_v8, %v539_v37 }
 0x36a   :  { %v985_v40 = vpop.eup %984 }
 0x36b   :  { %v545_v39 = vmul.f32 1.442695, %v543_v38  ;;  %v304_v62 = vsel %vm291_vm3, %v985_v40, 0.0  ;;  %v983_v38 = vld [vmem:[#allocation7] sm:$0xff]  }
 0x36c   :  { %v542_v23 = vpop.xlane.xlu1 %541  ;;  %932 = vmatpush3.bf16.msra.mxu1 %v983_v38 }
 0x36d   :  { %992 = vpow2.f32 %v545_v39  ;;  %v544_v41 = vsub.f32 %v534_v13, %v542_v23 }
 0x36e   :  { %v987_v42 = vpop.eup %986 }
 0x36f   :  { %v547_v43 = vmul.f32 1.442695, %v544_v41  ;;  %v314_v44 = vpack.c.bf16 %v987_v42, %v985_v40  ;;  %v307_v6 = vsel %vm291_vm3, %v987_v42, 0.0 }
 0x370   :  { %v662_v45 = vpop.xlane.xlu0 %661  ;;  %v561_v54 = vpop.permute.xlu1 %560 }
 0x371   :  { %994 = vpow2.f32 %v547_v43  ;;  %v666_v46 = vsub.f32 %v654_v17, %v662_v45  ;;  %890 = vmatmul.mubr.msk.bf16.vlgmr.msra.gmra.mxu0 %vm291_vm3, %v314_v44 }
 0x372   :  { %v989_v47 = vpop.eup %988  ;;  %901 = vmatprep.mubr.msk.bf16.mxu0 %vm1180_vm1, %v1179_v12 }
 0x373   :  { %v668_v48 = vmul.f32 1.442695, %v666_v46  ;;  %v425_v49 = vsel %vm291_vm3, %v989_v47, 0.0 }
 0x374   :  { %426 = vadd.xlane.f32.xlu0 %v425_v49  ;;  %v438_v50 = vpop.permute.xlu0 %437 }
 0x375   :  { %996 = vpow2.f32 %v668_v48  ;;  %900 = vmatpush3.bf16.msra.mxu0 %v438_v50 }
 0x376   :  { %v991_v51 = vpop.eup %990  ;;  %911 = vmatprep.subr.bf16.mxu0 %v1179_v12 }
 0x377   :  { %v428_v52 = vsel %vm291_vm3, %v991_v51, 0.0  ;;  %v435_v53 = vpack.c.bf16 %v991_v51, %v989_v47 }
 0x378   :  { %429 = vadd.xlane.f32.xlu1 %v428_v52 }
 0x379   :  { %902 = vmatmul.mubr.msk.bf16.vlgmr.msra.gmra.mxu0 %vm291_vm3, %v435_v53 }
 0x37a   :  { %v993_v55 = vpop.eup %992  ;;  %912 = vmatpush3.bf16.msra.mxu0 %v561_v54  ;;  %913 = vmatprep.mubr.msk.bf16.mxu0 %vm1180_vm1, %v1179_v12 }
 0x37b   :  { %v549_v56 = vsel %vm291_vm3, %v993_v55, 0.0  ;;  %923 = vmatprep.subr.bf16.mxu0 %v1179_v12 }
 0x37c   :  { %550 = vadd.xlane.f32.xlu0 %v549_v56 }
 0x37e   :  { %v995_v57 = vpop.eup %994 }
 0x37f   :  { %v552_v58 = vsel %vm291_vm3, %v995_v57, 0.0  ;;  %v559_v59 = vpack.c.bf16 %v995_v57, %v993_v55 }
 0x380   :  { %553 = vadd.xlane.f32.xlu0 %v552_v58 }
 0x381   :  { %914 = vmatmul.mubr.msk.bf16.vlgmr.msra.gmra.mxu0 %vm291_vm3, %v559_v59 }
 0x382   :  { %v997_v60 = vpop.eup %996  ;;  %925 = vmatprep.mubr.msk.bf16.mxu0 %vm1180_vm1, %v1179_v12 }
 0x383   :  { %v672_v61 = vsel %vm291_vm3, %v997_v60, 0.0 }
 0x384   :  { %673 = vadd.xlane.f32.xlu1 %v672_v61 }
 0x388   :  { %305 = vadd.xlane.f32.xlu1 %v304_v62 }
 0x3a1   :  { %v665_v63 = vpop.xlane.xlu1 %664 }
 0x3a2   :  { %v667_v0 = vsub.f32 %v1314_v22, %v665_v63 }
 0x3a4   :  { %v670_v1 = vmul.f32 1.442695, %v667_v0 }
 0x3a5   :  { %v684_v2 = vpop.permute.xlu1 %683 }
 0x3a6   :  { %998 = vpow2.f32 %v670_v1  ;;  %924 = vmatpush3.bf16.msra.mxu0 %v684_v2 }
 0x3b3   :  { %v999_v3 = vpop.eup %998 }
 0x3b4   :  { %v675_v4 = vsel %vm291_vm3, %v999_v3, 0.0  ;;  %v682_v5 = vpack.c.bf16 %v999_v3, %v997_v60 }
 0x3b5   :  { %676 = vadd.xlane.f32.xlu0 %v675_v4 }
 0x3b6   :  { %926 = vmatmul.mubr.msk.bf16.vlgmr.msra.gmra.mxu0 %vm291_vm3, %v682_v5 }
 0x3b9   :  { %308 = vadd.xlane.f32.xlu0 %v307_v6 }
 0x3fd   :  { %v427_v7 = vpop.xlane.xlu0 %426 }
 0x3fe   :  { %1000 = vrcp.f32 %v427_v7 }
 0x401   :  { %v430_v8 = vpop.xlane.xlu1 %429 }
 0x402   :  { %1002 = vrcp.f32 %v430_v8 }
 0x405   :  { %v551_v9 = vpop.xlane.xlu0 %550 }
 0x406   :  { %1004 = vrcp.f32 %v551_v9 }
 0x409   :  { %v554_v13 = vpop.xlane.xlu0 %553 }
 0x40a   :  { %1006 = vrcp.f32 %v554_v13 }
 0x40b   :  { %v1001_v18 = vpop.eup %1000 }
 0x40d   :  { %v674_v36 = vpop.xlane.xlu1 %673 }
 0x40e   :  { %1008 = vrcp.f32 %v674_v36 }
 0x40f   :  { %v1003_v19 = vpop.eup %1002 }
 0x411   :  { %v306_v47 = vpop.xlane.xlu1 %305 }
 0x413   :  { %v1005_v29 = vpop.eup %1004 }
 0x417   :  { %v1007_v30 = vpop.eup %1006 }
 0x41b   :  { %v1009_v40 = vpop.eup %1008 }
 0x431   :  { %v352_v10 = vpop.f32.mrf.mxu0 }
 0x433   :  { %v891_v11 = vpop.f32.mrf.mxu0 }
 0x435   :  { %v355_v14 = vpop.f32.mrf.mxu0 }
 0x437   :  { %v892_v15 = vpop.f32.mrf.mxu0 }
 0x439   :  { %v477_v16 = vpop.f32.mrf.mxu0 }
 0x43a   :  { %v484_v21 = vmul.f32 %v1001_v18, %v477_v16 }
 0x43b   :  { %v903_v17 = vpop.f32.mrf.mxu0 }
 0x43d   :  { %v480_v20 = vpop.f32.mrf.mxu0 }
 0x43e   :  { %v485_v22 = vmul.f32 %v1003_v19, %v480_v20  ;;  %v677_v37 = vpop.xlane.xlu0 %676 }
 0x43f   :  { %v904_v24 = vpop.f32.mrf.mxu0  ;;  %1010 = vrcp.f32 %v677_v37 }
 0x440   :  { %v961_v26 = vpack.i.bf16 %v485_v22, %v484_v21 }
 0x441   :  { %v600_v27 = vpop.f32.mrf.mxu0 }
 0x442   :  { %962 = vrot.lane.b32.xlu1 %v961_v26, %s1169_s27  ;;  %v607_v32 = vmul.f32 %v1005_v29, %v600_v27  ;;  %v309_v46 = vpop.xlane.xlu0 %308 }
 0x443   :  { %v915_v28 = vpop.f32.mrf.mxu0  ;;  %1012 = vrcp.f32 %v309_v46 }
 0x444   :  { %1014 = vrcp.f32 %v306_v47 }
 0x445   :  { %v603_v31 = vpop.f32.mrf.mxu0 }
 0x446   :  { %v608_v33 = vmul.f32 %v1007_v30, %v603_v31 }
 0x447   :  { %v916_v34 = vpop.f32.mrf.mxu0 }
 0x448   :  { %v966_v35 = vpack.i.bf16 %v608_v33, %v607_v32 }
 0x44a   :  { %967 = vrot.lane.b32.xlu0 %v966_v35, %s1187_s11 }
 0x44c   :  { %v1011_v12 = vpop.eup %1010 }
 0x450   :  { %v1013_v50 = vpop.eup %1012 }
 0x451   :  { %v1015_v53 = vpop.eup %1014  ;;  %v360_v57 = vmul.f32 %v1013_v50, %v355_v14 }
 0x452   :  { %v359_v56 = vmul.f32 %v1015_v53, %v352_v10 }
 0x476   :  { %v723_v39 = vpop.f32.mrf.mxu0 }
 0x477   :  { %v730_v42 = vmul.f32 %v1009_v40, %v723_v39 }
 0x478   :  { %v927_v23 = vpop.f32.mrf.mxu0 }
 0x47a   :  { %v726_v41 = vpop.f32.mrf.mxu0 }
 0x47b   :  { %v731_v43 = vmul.f32 %v1011_v12, %v726_v41 }
 0x47c   :  { %v928_v44 = vpop.f32.mrf.mxu0 }
 0x47d   :  { %v971_v45 = vpack.i.bf16 %v731_v43, %v730_v42 }
 0x47f   :  { %972 = vrot.lane.b32.xlu1 %v971_v45, %s1188_s12 }
 0x4b4   :  { %v963_v48 = vpop.permute.xlu1 %962 }
 0x4b5   :  { %v965_v51 = vunpack.i.h.bf16 %v963_v48  ;;  %v964_v52 = vunpack.i.l.bf16 %v963_v48 }
 0x4b7   :  { %v757_v59 = vsel %vm243_vm2, %v360_v57, %v965_v51  ;;  %v756_v60 = vsel %vm243_vm2, %v359_v56, %v964_v52 }
 0x4bc   :  { %v968_v49 = vpop.permute.xlu0 %967 }
 0x4bd   :  { %v970_v54 = vunpack.i.h.bf16 %v968_v49  ;;  %v969_v55 = vunpack.i.l.bf16 %v968_v49 }
 0x4bf   :  { %v759_v63 = vsel %vm291_vm3, %v757_v59, %v970_v54  ;;  %v758_v0 = vsel %vm291_vm3, %v756_v60, %v969_v55 }
 0x4f1   :  { %v973_v58 = vpop.permute.xlu1 %972 }
 0x4f2   :  { %v975_v61 = vunpack.i.h.bf16 %v973_v58  ;;  %v974_v62 = vunpack.i.l.bf16 %v973_v58 }
 0x4f4   :  { %v762_v1 = vsel %vm760_vm4, %v759_v63, %v975_v61  ;;  %v761_v2 = vsel %vm760_vm4, %v758_v0, %v974_v62 }
 0x4f5   :  { %v763_v3 = vpack.c.bf16 %v762_v1, %v761_v2 }
 0x4f7   :  { %934 = vmatmul.mubr.msk.bf16.vlgmr.msra.gmra.mxu1 %vm134_vm0, %v763_v3 }
 0x5b7   :  { %v817_v4 = vpop.f32.mrf.mxu1 }
 0x5b8   :  { %824 = vst.msk [vmem:[#allocation13] sm:$0xff] %vm134_vm0, %v817_v4 }
 0x5b9   :  { %v935_v5 = vpop.f32.mrf.mxu1 }
 0x5bb   :  { %v820_v6 = vpop.f32.mrf.mxu1 }
 0x5bc   :  { %825 = vst.msk [vmem:[#allocation13 + $0x8] sm:$0xff] %vm134_vm0, %v820_v6 }
 0x5bd   :  { %v936_v7 = vpop.f32.mrf.mxu1 }
 0x5be   :  { %1147 = shalt.err (!%p1144_p6)
}
 0x5bf   :  { %837 = dma.vmem_to_hbm [thread:$0]  %s832_s13, 256, %s1362_s6, [#allocation4], %s1168_s26, %s1168_s26, %s1169_s27  }
 0x5c0   :  { %1164 = dma.done.wait [#allocation4], 256  }
 0x5c1   :  { %1165 = vsyncadd [#allocation4], 4294967040 }
 0x5c2   :  { %841 = vsyncpa [#allocation3], 1 }
 0x5c3   :  { %842 = vsyncpa [#allocation6], 1 }
 0x5c4   :  { %843 = vsyncpa [#allocation9], 1 }
 0x5c5   :  { %844 = vsyncpa [#allocation12], 1 }
 0x5c6   :  { %845 = vsyncpa [#allocation4], 1 }

</bundles_post_ra>
